<compile_context>
chip_gen: v6e
topology: v6e:2x2x1
jax: 0.10.0
libtpu: 0.0.40
codegen_flags: <defaults>
</compile_context>

<pallas_src>
import jax
import jax.numpy as jnp
from jax.experimental import pallas as pl
from jax.experimental.pallas import tpu as pltpu

_LANE = 128


def _round_up(x, m):
    return ((x + m - 1) // m) * m


# ----------------------------------------------------------------------------
# Pallas kernel: fused conv1(+bn1)+relu -> conv2(+bn2)+relu -> conv3
# Activations stay in (C, TILE_N) layout: points on the lane axis.
# ----------------------------------------------------------------------------
def _approach_mlp_kernel(x_ref, w1_ref, b1_ref, w2_ref, b2_ref, w3_ref, b3_ref,
                         o_ref):
    w1 = w1_ref[...]
    b1 = b1_ref[...]
    w2 = w2_ref[...]
    b2 = b2_ref[...]
    w3 = w3_ref[...]
    b3 = b3_ref[...]
    # B is small and static -> unrolled Python loop.  Each iteration is a
    # clean 2-D (C, TILE_N) matmul chain ending in a lane-dense
    # (Cout_pad, TILE_N) store (no masked vst).
    for b in range(x_ref.shape[0]):
        x = x_ref[b].astype(jnp.bfloat16)                           # (Cin, TN)
        h = jnp.dot(w1, x, preferred_element_type=jnp.float32)
        h = jnp.maximum(h + b1, 0.0)                                # relu(bn1(conv1))
        h = jnp.dot(w2, h.astype(jnp.bfloat16),
                    preferred_element_type=jnp.float32)
        h = jnp.maximum(h + b2, 0.0)                                # relu(bn2(conv2))
        h = jnp.dot(w3, h.astype(jnp.bfloat16),
                    preferred_element_type=jnp.float32)
        o_ref[b] = (h + b3).astype(o_ref.dtype)                     # conv3


def approach_mlp(x_bcn, w1, b1, w2, b2, w3, b3, *, tile_n=2048):
    """x_bcn: (B, Cin, N).  wK: (CoutK, CinK) bf16, bK: (CoutK, 1) f32.
    Returns (B, Cout, N) float32, Cout = 2 + num_view."""
    B, Cin, N = x_bcn.shape
    Chid = w1.shape[0]
    Cout = w3.shape[0]

    # Zero-pad the (tiny) output-channel axis up to a sublane multiple so the
    # layer-2/3 tiles and the final store are unmasked.  Sliced off below.
    cout_p = _round_up(Cout, 8)
    if cout_p != Cout:
        pad_o = cout_p - Cout
        w2 = jnp.pad(w2, ((0, pad_o), (0, 0)))
        b2 = jnp.pad(b2, ((0, pad_o), (0, 0)))
        w3 = jnp.pad(w3, ((0, pad_o), (0, pad_o)))
        b3 = jnp.pad(b3, ((0, pad_o), (0, 0)))

    # Tile the point axis: largest lane-multiple tile <= tile_n, but keep >= 2
    # grid steps when N allows it (v7x has 2 TensorCores; on v5e/v6e one extra
    # ~0.35us step is negligible).  If N is not a tile multiple, pad N UP to
    # the next tile multiple instead of shrinking the tile.
    n_lane = _round_up(N, _LANE)
    tn = max(_LANE, min(_round_up(tile_n, _LANE), n_lane))
    if n_lane > _LANE:
        tn = min(tn, _round_up((n_lane + 1) // 2, _LANE))
    n_pad = _round_up(N, tn)
    if n_pad != N:
        x_bcn = jnp.pad(x_bcn, ((0, 0), (0, 0), (0, n_pad - N)))
    grid = (n_pad // tn,)

    itemsize = jnp.dtype(x_bcn.dtype).itemsize
    cost = pl.CostEstimate(
        flops=2 * B * n_pad * (Cin * Chid + Chid * cout_p + cout_p * cout_p),
        transcendentals=0,
        bytes_accessed=(B * Cin * n_pad * itemsize                  # activations in
                        + B * cout_p * n_pad * 4                    # result out
                        + 2 * (Cin * Chid + cout_p * Chid + cout_p * cout_p)
                        + 4 * (Chid + 2 * cout_p)),                 # weights+biases
    )

    # Weights/biases use constant index_maps -> loaded once, VMEM-resident.
    out = pl.pallas_call(
        _approach_mlp_kernel,
        out_shape=jax.ShapeDtypeStruct((B, cout_p, n_pad), jnp.float32),
        grid=grid,
        in_specs=[
            pl.BlockSpec((B, Cin, tn), lambda n: (0, 0, n)),
            pl.BlockSpec((Chid, Cin), lambda n: (0, 0)),
            pl.BlockSpec((Chid, 1), lambda n: (0, 0)),
            pl.BlockSpec((cout_p, Chid), lambda n: (0, 0)),
            pl.BlockSpec((cout_p, 1), lambda n: (0, 0)),
            pl.BlockSpec((cout_p, cout_p), lambda n: (0, 0)),
            pl.BlockSpec((cout_p, 1), lambda n: (0, 0)),
        ],
        out_specs=pl.BlockSpec((B, cout_p, tn), lambda n: (0, 0, n)),
        compiler_params=pltpu.CompilerParams(
            dimension_semantics=("parallel",)),
        cost_estimate=cost,
    )(x_bcn, w1, b1, w2, b2, w3, b3)

    # Slice off channel + point padding (padded lanes carry bias/ReLU garbage;
    # never hand the padded buffer to a consumer directly).
    return out[:, :Cout, :N]


# ----------------------------------------------------------------------------
# Parameter setup (deterministic, synthetic) + BN folding (eval-mode BN)
# ----------------------------------------------------------------------------
def init_params(key, in_dim, num_view):
    out_dim = 2 + num_view
    ks = jax.random.split(key, 8)

    def conv(k, cin, cout):
        w = jax.random.normal(k, (cout, cin), jnp.float32) * 0.1   # torch layout (Cout, Cin)
        b = jax.random.normal(jax.random.fold_in(k, 1), (cout,), jnp.float32) * 0.01
        return w, b

    def bn(k, c):
        gamma = 1.0 + 0.05 * jax.random.normal(k, (c,), jnp.float32)
        beta = 0.02 * jax.random.normal(jax.random.fold_in(k, 1), (c,), jnp.float32)
        mean = 0.01 * jax.random.normal(jax.random.fold_in(k, 2), (c,), jnp.float32)
        var = 1.0 + 0.1 * jax.random.uniform(jax.random.fold_in(k, 3), (c,), jnp.float32)
        return gamma, beta, mean, var

    p = {}
    p["conv1"] = conv(ks[0], in_dim, in_dim)
    p["conv2"] = conv(ks[1], in_dim, out_dim)
    p["conv3"] = conv(ks[2], out_dim, out_dim)
    p["bn1"] = bn(ks[3], in_dim)
    p["bn2"] = bn(ks[4], out_dim)
    return p


def fold_bn(conv_wb, bn_params, eps=1e-5):
    """Fold eval-mode BatchNorm into a 1x1 conv.

    Returns weight in native (Cout, Cin) layout and bias as (Cout, 1)."""
    w, b = conv_wb                       # w: (Cout, Cin), b: (Cout,)
    gamma, beta, mean, var = bn_params
    scale = gamma / jnp.sqrt(var + eps)  # (Cout,)
    w_eff = w * scale[:, None]
    b_eff = (b - mean) * scale + beta
    return w_eff, b_eff[:, None]


# ----------------------------------------------------------------------------
# Forward pass (Pallas kernel for the MLP; static-shape glue in plain JAX)
# ----------------------------------------------------------------------------
def approachnet_index_forward(seed_xyz, seed_features, end_points, params,
                              num_view):
    B, num_seed, _ = seed_xyz.shape

    w1, b1 = fold_bn(params["conv1"], params["bn1"])
    w2, b2 = fold_bn(params["conv2"], params["bn2"])
    w3 = params["conv3"][0]
    b3 = params["conv3"][1][:, None]

    # Native (B, C, N) layout end-to-end.
    # TODO(synk): have the upstream backbone emit seed_features in bf16 (the
    # in-kernel cast becomes a no-op and input HBM traffic halves).
    feats = approach_mlp(
        seed_features,
        w1.astype(jnp.bfloat16), b1.astype(jnp.float32),
        w2.astype(jnp.bfloat16), b2.astype(jnp.float32),
        w3.astype(jnp.bfloat16), b3.astype(jnp.float32))      # (B, 2+V, N)

    objectness_score = feats[:, :2, :]                        # (B, 2, N) slice
    view_score_vn = feats[:, 2:2 + num_view, :]               # native (B, V, N) slice
    end_points["objectness_score"] = objectness_score
    end_points["view_score_vn"] = view_score_vn
    # Module contract: view_score is (B, num_seed, num_view).  This transpose
    # is the one remaining wrapper-side HBM pass; a production consumer should
    # instead top-k / argmax over the view (sublane) axis of view_score_vn and
    # skip it entirely.
    end_points["view_score"] = jnp.transpose(view_score_vn, (0, 2, 1))

    # torch.gather(index_mask, 1, fp2_inds)
    index_mask = jnp.take_along_axis(
        end_points["index_mask"], end_points["fp2_inds"].astype(jnp.int32), axis=1)
    end_points["index_mask_gathered"] = index_mask

    # TODO(synk): the `(index_mask.sum(1) <= 3)` pdb guard and the per-batch
    # dynamic selection (torch.where / sort with data-dependent num_per_seed /
    # repeat_interleave) have data-dependent output shapes and cannot be
    # expressed with static-shape Pallas/JAX ops.
    # TODO(synk): generate_grasp_views / batch_viewpoint_params_to_matrix are
    # external helpers not defined in the module source; downstream
    # grasp_top_view_xyz / grasp_top_view_rot depend on the dynamic selection
    # above and are omitted here.
    return end_points


# ----------------------------------------------------------------------------
# Reference (plain JAX) mirroring the kernel's bf16-operand / f32-accum math.
# ----------------------------------------------------------------------------
def _ref_mlp(x_bcn, w1, b1, w2, b2, w3, b3):
    x = x_bcn.astype(jnp.bfloat16)
    h = jnp.einsum("oc,bcn->bon", w1, x, preferred_element_type=jnp.float32)
    h = jnp.maximum(h + b1, 0.0)
    h = jnp.einsum("oc,bcn->bon", w2, h.astype(jnp.bfloat16),
                   preferred_element_type=jnp.float32)
    h = jnp.maximum(h + b2, 0.0)
    h = jnp.einsum("oc,bcn->bon", w3, h.astype(jnp.bfloat16),
                   preferred_element_type=jnp.float32)
    return h + b3


if __name__ == "__main__":
    B, num_seed, in_dim, num_view = 2, 256, 32, 12
    num_points = 512

    key = jax.random.PRNGKey(0)
    k_xyz, k_feat, k_inds, k_mask, k_par = jax.random.split(key, 5)

    seed_xyz = jax.random.normal(k_xyz, (B, num_seed, 3), jnp.float32)
    seed_features = jax.random.normal(k_feat, (B, in_dim, num_seed), jnp.float32)
    fp2_inds = jax.random.randint(k_inds, (B, num_seed), 0, num_points, jnp.int32)
    index_mask = (jax.random.uniform(k_mask, (B, num_points)) > 0.3).astype(jnp.int32)
    fp2_xyz = jax.random.normal(jax.random.fold_in(k_xyz, 7), (B, num_points, 3),
                                jnp.float32)

    end_points = {"index_mask": index_mask, "fp2_inds": fp2_inds,
                  "fp2_xyz": fp2_xyz}
    params = init_params(k_par, in_dim, num_view)

    out = approachnet_index_forward(seed_xyz, seed_features, end_points, params,
                                    num_view)
    jax.block_until_ready(out["objectness_score"])
    jax.block_until_ready(out["view_score"])

    # Spot-check the Pallas MLP against a plain-JAX reference.
    w1, b1 = fold_bn(params["conv1"], params["bn1"])
    w2, b2 = fold_bn(params["conv2"], params["bn2"])
    w3, b3 = params["conv3"][0], params["conv3"][1][:, None]
    got = approach_mlp(seed_features,
                       w1.astype(jnp.bfloat16), b1,
                       w2.astype(jnp.bfloat16), b2,
                       w3.astype(jnp.bfloat16), b3)
    ref = _ref_mlp(seed_features,
                   w1.astype(jnp.bfloat16), b1,
                   w2.astype(jnp.bfloat16), b2,
                   w3.astype(jnp.bfloat16), b3)
    assert got.shape == (B, 2 + num_view, num_seed)
    max_err = float(jnp.max(jnp.abs(got - ref)))
    assert jnp.allclose(got, ref, atol=5e-3, rtol=5e-3), f"kernel mismatch {max_err}"

    # Also check an awkward (non-tile-multiple) point count: N gets padded,
    # never the tile shrunk.
    got_odd = approach_mlp(seed_features[:, :, :200],
                           w1.astype(jnp.bfloat16), b1,
                           w2.astype(jnp.bfloat16), b2,
                           w3.astype(jnp.bfloat16), b3)
    assert got_odd.shape == (B, 2 + num_view, 200)
    assert jnp.allclose(got_odd, ref[:, :, :200], atol=5e-3, rtol=5e-3)

    assert out["objectness_score"].shape == (B, 2, num_seed)
    assert out["view_score"].shape == (B, num_seed, num_view)
    assert out["view_score_vn"].shape == (B, num_view, num_seed)
    assert out["index_mask_gathered"].shape == (B, num_seed)

    print("KERNEL_OK")
</pallas_src>

<mosaic_0001>
module attributes {stable_mosaic.version = 11 : i64} {
  func.func @_approach_mlp_kernel(%arg0: i32, %arg1: memref<2x32x128xf32, #tpu.memory_space<vmem>>, %arg2: memref<32x32xbf16, #tpu.memory_space<vmem>>, %arg3: memref<32x1xf32, #tpu.memory_space<vmem>>, %arg4: memref<16x32xbf16, #tpu.memory_space<vmem>>, %arg5: memref<16x1xf32, #tpu.memory_space<vmem>>, %arg6: memref<16x16xbf16, #tpu.memory_space<vmem>>, %arg7: memref<16x1xf32, #tpu.memory_space<vmem>>, %arg8: memref<2x16x128xf32, #tpu.memory_space<vmem>>) attributes {dimension_semantics = [#tpu.dimension_semantics<parallel>], iteration_bounds = array<i64: 2>, scalar_prefetch = 0 : i64, scratch_operands = 0 : i64, tpu.core_type = #tpu.core_type<tc>, window_params = [{transform_indices = @transform_0, window_bounds = array<i64: 2, 32, 128>}, {pipeline_mode = #tpu.pipeline_mode<synchronous>, transform_indices = @transform_1, window_bounds = array<i64: 32, 32>}, {pipeline_mode = #tpu.pipeline_mode<synchronous>, transform_indices = @transform_2, window_bounds = array<i64: 32, 1>}, {pipeline_mode = #tpu.pipeline_mode<synchronous>, transform_indices = @transform_3, window_bounds = array<i64: 16, 32>}, {pipeline_mode = #tpu.pipeline_mode<synchronous>, transform_indices = @transform_4, window_bounds = array<i64: 16, 1>}, {pipeline_mode = #tpu.pipeline_mode<synchronous>, transform_indices = @transform_5, window_bounds = array<i64: 16, 16>}, {pipeline_mode = #tpu.pipeline_mode<synchronous>, transform_indices = @transform_6, window_bounds = array<i64: 16, 1>}, {transform_indices = @transform_7, window_bounds = array<i64: 2, 16, 128>}]} {
    %c0 = arith.constant 0 : index
    %c0_0 = arith.constant 0 : index
    %0 = vector.load %arg2[%c0, %c0_0] : memref<32x32xbf16, #tpu.memory_space<vmem>>, vector<32x32xbf16>
    %c0_1 = arith.constant 0 : index
    %c0_2 = arith.constant 0 : index
    %1 = vector.load %arg3[%c0_1, %c0_2] : memref<32x1xf32, #tpu.memory_space<vmem>>, vector<32x1xf32>
    %c0_3 = arith.constant 0 : index
    %c0_4 = arith.constant 0 : index
    %2 = vector.load %arg4[%c0_3, %c0_4] : memref<16x32xbf16, #tpu.memory_space<vmem>>, vector<16x32xbf16>
    %c0_5 = arith.constant 0 : index
    %c0_6 = arith.constant 0 : index
    %3 = vector.load %arg5[%c0_5, %c0_6] : memref<16x1xf32, #tpu.memory_space<vmem>>, vector<16x1xf32>
    %c0_7 = arith.constant 0 : index
    %c0_8 = arith.constant 0 : index
    %4 = vector.load %arg6[%c0_7, %c0_8] : memref<16x16xbf16, #tpu.memory_space<vmem>>, vector<16x16xbf16>
    %c0_9 = arith.constant 0 : index
    %c0_10 = arith.constant 0 : index
    %5 = vector.load %arg7[%c0_9, %c0_10] : memref<16x1xf32, #tpu.memory_space<vmem>>, vector<16x1xf32>
    %c0_11 = arith.constant 0 : index
    %c0_12 = arith.constant 0 : index
    %c0_13 = arith.constant 0 : index
    %6 = vector.load %arg1[%c0_11, %c0_12, %c0_13] : memref<2x32x128xf32, #tpu.memory_space<vmem>>, vector<1x32x128xf32>
    %7 = vector.shape_cast %6 : vector<1x32x128xf32> to vector<32x128xf32>
    %8 = arith.truncf %7 : vector<32x128xf32> to vector<32x128xbf16>
    %cst = arith.constant dense<0.000000e+00> : vector<32x128xf32>
    %9 = tpu.matmul %0, %8, %cst {dimension_numbers = #tpu.dot_dimension_numbers<[1], [0], [0], [1], [0, 0, 1, 1], [], []>} : vector<32x32xbf16>, vector<32x128xbf16>, vector<32x128xf32> -> vector<32x128xf32>
    %10 = vector.broadcast %1 : vector<32x1xf32> to vector<32x128xf32>
    %11 = arith.addf %9, %10 : vector<32x128xf32>
    %cst_14 = arith.constant 0.000000e+00 : f32
    %12 = vector.broadcast %cst_14 : f32 to vector<32x128xf32>
    %13 = arith.maximumf %11, %12 : vector<32x128xf32>
    %14 = arith.truncf %13 : vector<32x128xf32> to vector<32x128xbf16>
    %cst_15 = arith.constant dense<0.000000e+00> : vector<16x128xf32>
    %15 = tpu.matmul %2, %14, %cst_15 {dimension_numbers = #tpu.dot_dimension_numbers<[1], [0], [0], [1], [0, 0, 1, 1], [], []>} : vector<16x32xbf16>, vector<32x128xbf16>, vector<16x128xf32> -> vector<16x128xf32>
    %16 = vector.broadcast %3 : vector<16x1xf32> to vector<16x128xf32>
    %17 = arith.addf %15, %16 : vector<16x128xf32>
    %cst_16 = arith.constant 0.000000e+00 : f32
    %18 = vector.broadcast %cst_16 : f32 to vector<16x128xf32>
    %19 = arith.maximumf %17, %18 : vector<16x128xf32>
    %20 = arith.truncf %19 : vector<16x128xf32> to vector<16x128xbf16>
    %cst_17 = arith.constant dense<0.000000e+00> : vector<16x128xf32>
    %21 = tpu.matmul %4, %20, %cst_17 {dimension_numbers = #tpu.dot_dimension_numbers<[1], [0], [0], [1], [0, 0, 1, 1], [], []>} : vector<16x16xbf16>, vector<16x128xbf16>, vector<16x128xf32> -> vector<16x128xf32>
    %22 = vector.broadcast %5 : vector<16x1xf32> to vector<16x128xf32>
    %23 = arith.addf %21, %22 : vector<16x128xf32>
    %c0_18 = arith.constant 0 : index
    %c0_19 = arith.constant 0 : index
    %c0_20 = arith.constant 0 : index
    %24 = vector.load %arg8[%c0_18, %c0_19, %c0_20] : memref<2x16x128xf32, #tpu.memory_space<vmem>>, vector<1x16x128xf32>
    %25 = vector.shape_cast %24 : vector<1x16x128xf32> to vector<16x128xf32>
    %26 = vector.shape_cast %23 : vector<16x128xf32> to vector<1x16x128xf32>
    tpu.vector_store %arg8[%c0_18, %c0_19, %c0_20], %26 {strides = array<i32>} : memref<2x16x128xf32, #tpu.memory_space<vmem>>, vector<1x16x128xf32>,
    %c1 = arith.constant 1 : index
    %c0_21 = arith.constant 0 : index
    %c0_22 = arith.constant 0 : index
    %27 = vector.load %arg1[%c1, %c0_21, %c0_22] : memref<2x32x128xf32, #tpu.memory_space<vmem>>, vector<1x32x128xf32>
    %28 = vector.shape_cast %27 : vector<1x32x128xf32> to vector<32x128xf32>
    %29 = arith.truncf %28 : vector<32x128xf32> to vector<32x128xbf16>
    %cst_23 = arith.constant dense<0.000000e+00> : vector<32x128xf32>
    %30 = tpu.matmul %0, %29, %cst_23 {dimension_numbers = #tpu.dot_dimension_numbers<[1], [0], [0], [1], [0, 0, 1, 1], [], []>} : vector<32x32xbf16>, vector<32x128xbf16>, vector<32x128xf32> -> vector<32x128xf32>
    %31 = vector.broadcast %1 : vector<32x1xf32> to vector<32x128xf32>
    %32 = arith.addf %30, %31 : vector<32x128xf32>
    %cst_24 = arith.constant 0.000000e+00 : f32
    %33 = vector.broadcast %cst_24 : f32 to vector<32x128xf32>
    %34 = arith.maximumf %32, %33 : vector<32x128xf32>
    %35 = arith.truncf %34 : vector<32x128xf32> to vector<32x128xbf16>
    %cst_25 = arith.constant dense<0.000000e+00> : vector<16x128xf32>
    %36 = tpu.matmul %2, %35, %cst_25 {dimension_numbers = #tpu.dot_dimension_numbers<[1], [0], [0], [1], [0, 0, 1, 1], [], []>} : vector<16x32xbf16>, vector<32x128xbf16>, vector<16x128xf32> -> vector<16x128xf32>
    %37 = vector.broadcast %3 : vector<16x1xf32> to vector<16x128xf32>
    %38 = arith.addf %36, %37 : vector<16x128xf32>
    %cst_26 = arith.constant 0.000000e+00 : f32
    %39 = vector.broadcast %cst_26 : f32 to vector<16x128xf32>
    %40 = arith.maximumf %38, %39 : vector<16x128xf32>
    %41 = arith.truncf %40 : vector<16x128xf32> to vector<16x128xbf16>
    %cst_27 = arith.constant dense<0.000000e+00> : vector<16x128xf32>
    %42 = tpu.matmul %4, %41, %cst_27 {dimension_numbers = #tpu.dot_dimension_numbers<[1], [0], [0], [1], [0, 0, 1, 1], [], []>} : vector<16x16xbf16>, vector<16x128xbf16>, vector<16x128xf32> -> vector<16x128xf32>
    %43 = vector.broadcast %5 : vector<16x1xf32> to vector<16x128xf32>
    %44 = arith.addf %42, %43 : vector<16x128xf32>
    %c1_28 = arith.constant 1 : index
    %c0_29 = arith.constant 0 : index
    %c0_30 = arith.constant 0 : index
    %45 = vector.load %arg8[%c1_28, %c0_29, %c0_30] : memref<2x16x128xf32, #tpu.memory_space<vmem>>, vector<1x16x128xf32>
    %46 = vector.shape_cast %45 : vector<1x16x128xf32> to vector<16x128xf32>
    %47 = vector.shape_cast %44 : vector<16x128xf32> to vector<1x16x128xf32>
    tpu.vector_store %arg8[%c1_28, %c0_29, %c0_30], %47 {strides = array<i32>} : memref<2x16x128xf32, #tpu.memory_space<vmem>>, vector<1x16x128xf32>,
    return
  }
  func.func @transform_0(%arg0: i32) -> (i32, i32, i32) {
    %c0_i32 = arith.constant 0 : i32
    %c0_i32_0 = arith.constant 0 : i32
    %c0_i32_1 = arith.constant 0 : i32
    return %c0_i32, %c0_i32_0, %arg0 : i32, i32, i32
  }
  func.func @transform_1(%arg0: i32) -> (i32, i32) {
    %c0_i32 = arith.constant 0 : i32
    %c0_i32_0 = arith.constant 0 : i32
    %c0_i32_1 = arith.constant 0 : i32
    return %c0_i32, %c0_i32_0 : i32, i32
  }
  func.func @transform_2(%arg0: i32) -> (i32, i32) {
    %c0_i32 = arith.constant 0 : i32
    %c0_i32_0 = arith.constant 0 : i32
    %c0_i32_1 = arith.constant 0 : i32
    return %c0_i32, %c0_i32_0 : i32, i32
  }
  func.func @transform_3(%arg0: i32) -> (i32, i32) {
    %c0_i32 = arith.constant 0 : i32
    %c0_i32_0 = arith.constant 0 : i32
    %c0_i32_1 = arith.constant 0 : i32
    return %c0_i32, %c0_i32_0 : i32, i32
  }
  func.func @transform_4(%arg0: i32) -> (i32, i32) {
    %c0_i32 = arith.constant 0 : i32
    %c0_i32_0 = arith.constant 0 : i32
    %c0_i32_1 = arith.constant 0 : i32
    return %c0_i32, %c0_i32_0 : i32, i32
  }
  func.func @transform_5(%arg0: i32) -> (i32, i32) {
    %c0_i32 = arith.constant 0 : i32
    %c0_i32_0 = arith.constant 0 : i32
    %c0_i32_1 = arith.constant 0 : i32
    return %c0_i32, %c0_i32_0 : i32, i32
  }
  func.func @transform_6(%arg0: i32) -> (i32, i32) {
    %c0_i32 = arith.constant 0 : i32
    %c0_i32_0 = arith.constant 0 : i32
    %c0_i32_1 = arith.constant 0 : i32
    return %c0_i32, %c0_i32_0 : i32, i32
  }
  func.func @transform_7(%arg0: i32) -> (i32, i32, i32) {
    %c0_i32 = arith.constant 0 : i32
    %c0_i32_0 = arith.constant 0 : i32
    %c0_i32_1 = arith.constant 0 : i32
    return %c0_i32, %c0_i32_0, %arg0 : i32, i32, i32
  }
}

</mosaic_0001>

<bundles_post_ra>
// kernel: tpu_custom_call.1
= control target key start
LH: loop header
LB: loop body
LE: loop exit
PB: predicated region body
PF: predicated region fallthrough
CT: control target
= control target key end

     0   :  { %12 = vsyncpa [#allocation3], 0  ;;  %s1294_s0 = inlined_call_operand.hbm [shape: f32[2,32,256], index: 0, kind: input, shape index: {}]   ;;  %s1295_s1 = inlined_call_operand.vmem [shape: bf16[32,32], index: 1, kind: input, shape index: {}]   ;;  %s1296_s2 = inlined_call_operand.vmem [shape: f32[32,1], index: 2, kind: input, shape index: {}]   ;;  %s1297_s3 = inlined_call_operand.vmem [shape: bf16[16,32], index: 3, kind: input, shape index: {}]   ;;  %s1298_s4 = inlined_call_operand.vmem [shape: f32[16,1], index: 4, kind: input, shape index: {}]   ;;  %s1299_s5 = inlined_call_operand.vmem [shape: bf16[16,16], index: 5, kind: input, shape index: {}]   ;;  %s1300_s6 = inlined_call_operand.vmem [shape: f32[16,1], index: 6, kind: input, shape index: {}]   ;;  %s1301_s7 = inlined_call_operand.hbm [shape: f32[2,16,256], index: 7, kind: output, shape index: {}]  }
   0x1   :  { %14 = vsyncpa [#allocation3 + $0x1], 0 }
   0x2   :  { %15 = vsyncpa [#allocation4], 0 }
   0x3   :  { %17 = vsyncpa [#allocation4 + $0x1], 0  ;;  %s1069_s24 = smov 0   ;;  %s1071_s25 = smov 0  }
   0x4   :  { %s1073_s26 = smov 0   ;;  %s1075_s27 = smov 0  }
   0x5 LB: > { %s1090_s28 = sadd.s32 4294967295, %s1016_s27   ;;  %s771_s29 = sadd.s32 4294967294, %s1016_s27   ;;  %s1016_s27 = sphi %s1075_s27, %s1317_s27   ;;  %s1012_s26 = sphi %s1073_s26, %s1316_s26   ;;  %s1008_s25 = sphi %s1071_s25, %s1315_s25   ;;  %s1004_s24 = sphi %s1069_s24, %s1314_s24  }
   0x6   : > { %s1094_s30 = sadd.s32 1, %s1016_s27   ;;  %s30_s8 = sadd.s32 1, %s1012_s26 }
   0x7   : > { %s27_s9 = ssub.s32 %s1016_s27, %s1094_s30  ;;  %p37_p0 = scmp.ne.s32.totalorder %s1012_s26, %s1008_s25 }
   0x8   : > { %p28_p1 = scmp.eq.s32.totalorder %s27_s9, 0  ;;  %p38_p2 = scmp.eq.s32.totalorder %s1016_s27, 0 }
   0x9   : > { %p43_p3 = scmp.ne.s32.totalorder %s1008_s25, %s1004_s24  ;;  %p44_p4 = scmp.eq.s32.totalorder %s1090_s28, 0 }
   0xa   : > { %s1106_s10 = scalar_select %p28_p1, %s1012_s26, %s30_s8  }
   0xb   : > { %p1108_p5 = por %p38_p2, %p37_p0  ;;  %p1112_p6 = por %p44_p4, %p43_p3 }
   0xc   : > { %p193_p7 = scmp.eq.s32.totalorder %s1090_s28, 1  ;;  %p199_p8 = scmp.eq.s32.totalorder %s771_s29, 1 }
   0xd   : > { %s1305_s12 = scalar_select %p1112_p6, 1, 0 }
   0xe   : > { %p875_p10 = scmp.lt.s32.totalorder %s1016_s27, 2  ;;  %p1119_p11 = por %p193_p7, %p37_p0 }
   0xf   : > { %p1123_p12 = por %p199_p8, %p43_p3  ;;  %s237_s15 = sand.u32 1, %s1012_s26  }
  0x10   : > { %s1306_s13 = scalar_select %p1119_p11, 1, 0 }
  0x11   : > { %s1307_s14 = scalar_select %p1123_p12, 1, 0 }
  0x12   : > { %s775_s16 = sshll.u32 %s1016_s27, 7  ;;  %s774_s17 = sshll.u32 %s237_s15, 6 }
  0x13   : > { %s1132_s20 = scalar_lea.hbm %s1294_s0, %s775_s16  ;;  %s241_s21 = scalar_lea.vmem [#allocation2], %s774_s17 }
  0x14   : > { %s247_s22 = sshll.u32 %s241_s21, 4  ;;  %p1136_p13 = pnand %p875_p10, %p1108_p5  ;;  %s1140_s22 = int_to_ptr.vmem [resolvable:$true] %s247_s22 }
  0x15   : > { %s1143_s29 = scalar_lea.sflag [#allocation3], %s237_s15  ;;  %s924_s8 = scalar_lea.hbm %s1132_s20, 1024 }
  0x16   : > { %p925_p1 = scmp.ne.s32.totalorder %s1132_s20, %s924_s8  ;;  %p926_p2 = pneg %p1136_p13 }
  0x17   : > { %s929_s11 = scalar_lea.hbm %s1294_s0, 2048  ;;  %p930_p5 = scmp.lt.s32.totalorder %s1132_s20, %s1294_s0 }
  0x18   : > { %p927_p3 = pnand %p926_p2, %p925_p1  ;;  %p931_p7 = scmp.lt.s32.totalorder %s929_s11, %s924_s8 }
  0x1a   : > { %p928_p4 = pneg %p927_p3  ;;  %p932_p8 = por %p931_p7, %p930_p5 }
  0x1c   : > { %p933_p10 = pnand %p932_p8, %p928_p4 }
  0x1e   : > { %936 = shalt.err (!%p933_p10)
}
  0x1f   : > { %s937_s15 = scalar_lea.vmem %s1140_s22, 1024  ;;  %s1018_s19 = smov [#allocation2]  }
  0x20   : > { %p938_p9 = scmp.ne.s32.totalorder %s1140_s22, %s937_s15  ;;  %s942_s21 = sshll.u32 %s1018_s19, 4  ;;  %s943_s21 = int_to_ptr.vmem [resolvable:$false] %s942_s21 }
  0x21   : > { %s944_s9 = scalar_lea.vmem %s943_s21, 2048  ;;  %p945_p3 = scmp.lt.s32.totalorder %s1140_s22, %s943_s21 }
  0x22   : > { %p940_p0 = pnand %p938_p9, %p926_p2  ;;  %p946_p12 = scmp.lt.s32.totalorder %s944_s9, %s937_s15 }
  0x24   : > { %p941_p1 = pneg %p940_p0  ;;  %p947_p11 = por %p946_p12, %p945_p3 }
  0x26   : > { %p948_p6 = pnand %p947_p11, %p941_p1 }
  0x28   : > { %951 = shalt.err (!%p948_p6)
}
  0x29   : > { %s1019_s8 = smov 256   ;;  %s1020_s16 = smov 128  }
  0x2a   : > { %s1021_s11 = smov 8   ;;  %p255_p9 = scmp.lt.s32.totalorder %s1016_s27, 3 }
  0x2b   : > { %870 = dma.hbm_to_vmem [thread:$0]  (!%p1136_p13), %s1132_s20, 1024, %s1140_s22, %s1143_s29, %s1019_s8, %s1020_s16, %s1021_s11  }
  0x2c   : > { %p1309_p0 = scmp.ge.s32.totalorder %s1016_s27, 1 }
  0x2e   : > { %p256_p2 = pnand %p1309_p0, %p255_p9 }
  0x2f   : > { %s1168_s17 = sand.u32 (!%p256_p2), 1, %s1008_s25   ;;  %p1310_p6 = scmp.ne.s32.totalorder (!%p256_p2), %s1305_s12, 0 }
  0x30   : > { %259 = sbr.rel (%p256_p2) target bundleno = 913 (0x391), region = 48  ;;  %s777_s18 = sshll.u32 (!%p256_p2), %s1168_s17, 6 }
  0x31   : > { %s262_s15 = scalar_lea.sflag (!%p256_p2), [#allocation3], %s1168_s17  ;;  %s1172_s19 = scalar_lea.vmem (!%p256_p2), [#allocation2], %s777_s18 }
  0x35   : > { %995 = dma.done.wait (%p1310_p6), %s262_s15, 1024  }
  0x36   : > { %997 = vsyncadd (%p1310_p6), %s262_s15, 4294966272  ;;  %v1022_v0 = vmov 0   ;;  %v315_v1 = vld [vmem:[%s1172_s19 + $0x10] sm:$0xff]  ;;  %v316_v2 = vld [vmem:[%s1172_s19 + $0x18] sm:$0xff]  ;;  %vm349_vm0 = vcmask 261120   ;;  %v1023_v17 = vmov 0.0  }
  0x37   : > { %918 = vset.pattern.permute.xlu0 %v1022_v0  ;;  %919 = vset.pattern.permute.xlu1 %v1022_v0  ;;  %v313_v3 = vld [vmem:[%s1172_s19] sm:$0xff]  ;;  %v318_v4 = vpack.c.bf16 %v316_v2, %v315_v1  ;;  %v314_v5 = vld [vmem:[%s1172_s19 + $0x8] sm:$0xff]  ;;  %v303_v8 = vld [vmem:[%s1296_s2 + $0x10] sm:$0xff]  ;;  %vm1024_vm1 = vmmov 0   ;;  %vm488_vm2 = vcmask 130048   ;;  %s778_s15 = sshll.u32 %s1168_s17, 5 }
  0x38   : > { %v317_v6 = vpack.c.bf16 %v314_v5, %v313_v3  ;;  %v920_v7 = vld [vmem:[%s1295_s1] sm:$0xff]   ;;  %331 = vperm.xlu0 %918, %v303_v8   ;;  %v304_v10 = vld [vmem:[%s1296_s2 + $0x18] sm:$0xff]  ;;  %v921_v11 = vld [vmem:[%s1295_s1 + $0x8] sm:$0xff]   ;;  %827 = vmatprep.subr.bf16.mxu1 %v1023_v17  ;;  %s295_s20 = scalar_lea.vmem [#allocation5], %s778_s15  ;;  %s798_s12 = sshll.u32 %s1090_s28, 7 }
  0x39   : > { %819 = vmatprep.subr.bf16.mxu0 %v318_v4  ;;  %823 = vmatprep.mubr.msk.bf16.mxu0 %vm349_vm0, %v920_v7  ;;  %v301_v9 = vld [vmem:[%s1296_s2] sm:$0xff]  ;;  %v302_v12 = vld [vmem:[%s1296_s2 + $0x8] sm:$0xff]  ;;  %v789_v34 = vld [vmem:[%s1172_s19 + $0x30] sm:$0xff]  ;;  %s698_s22 = sshll.u32 %s295_s20, 4  ;;  %s1251_s21 = scalar_lea.hbm %s1301_s7, %s798_s12  ;;  %s1246_s22 = int_to_ptr.vmem [resolvable:$true] %s698_s22 }
  0x3a   : > { %820 = vmatpush3.bf16.msra.mxu0 %v318_v4  ;;  %321 = vperm.xlu1 %919, %v301_v9   ;;  %v307_v13 = vld [vmem:[%s1298_s4] sm:$0xff]  ;;  %v308_v14 = vld [vmem:[%s1298_s4 + $0x8] sm:$0xff]  ;;  %v790_v35 = vld [vmem:[%s1172_s19 + $0x38] sm:$0xff]  ;;  %s686_s9 = scalar_lea.sflag [#allocation4], %s1168_s17  ;;  %s952_s8 = scalar_lea.vmem %s1246_s22, 512 }
  0x3b   : > { %821 = vmatprep.subr.bf16.mxu0 %v317_v6  ;;  %v311_v15 = vld [vmem:[%s1300_s6] sm:$0xff]  ;;  %v312_v16 = vld [vmem:[%s1300_s6 + $0x8] sm:$0xff]  ;;  %831 = vmatprep.mubr.msk.bf16.mxu1 %vm1024_vm1, %v1023_v17  ;;  %v541_v37 = vpack.c.bf16 %v790_v35, %v789_v34  ;;  %p953_p11 = scmp.ne.s32.totalorder %s1246_s22, %s952_s8  ;;  %p1311_p12 = scmp.ne.s32.totalorder %s1306_s13, 0 }
  0x3c   : > { %336 = vperm.xlu0 %918, %v304_v10   ;;  %v787_v39 = vld [vmem:[%s1172_s19 + $0x20] sm:$0xff]  ;;  %v788_v40 = vld [vmem:[%s1172_s19 + $0x28] sm:$0xff]  ;;  %s1025_s28 = smov [#allocation5]  }
  0x3d   : > { %v922_v41 = vld [vmem:[%s1297_s3] sm:$0xff]   ;;  %v540_v42 = vpack.c.bf16 %v788_v40, %v787_v39  ;;  %p954_p13 = pnand %p953_p11, %p1311_p12  ;;  %s956_s16 = sshll.u32 %s1025_s28, 4  ;;  %s957_s16 = int_to_ptr.vmem [resolvable:$false] %s956_s16 }
  0x3e   : > { %822 = vmatpush3.bf16.msra.mxu0 %v317_v6  ;;  %326 = vperm.xlu1 %919, %v302_v12   ;;  %v923_v56 = vld [vmem:[%s1299_s5] sm:$0xff]   ;;  %s958_s11 = scalar_lea.vmem %s957_s16, 1024  ;;  %p959_p5 = scmp.lt.s32.totalorder %s1246_s22, %s957_s16 }
  0x3f   : > { %835 = vmatprep.subr.bf16.mxu0 %v1023_v17  ;;  %p955_p4 = pneg %p954_p13  ;;  %p960_p7 = scmp.lt.s32.totalorder %s958_s11, %s952_s8 }
  0x40   : > { %413 = vperm.xlu0 %918, %v307_v13  }
  0x41   : > { %824 = vmatmul.mubr.msk.bf16.vlgmr.msra.gmra.mxu0 %vm349_vm0, %v921_v11  ;;  %p961_p8 = por %p960_p7, %p959_p5 }
  0x42   : > { %418 = vperm.xlu1 %919, %v308_v14   ;;  %837 = vmatprep.mubr.msk.bf16.mxu0 %vm1024_vm1, %v1023_v17 }
  0x43   : > { %p962_p10 = pnand %p961_p8, %p955_p4 }
  0x44   : > { %475 = vperm.xlu0 %918, %v311_v15  }
  0x46   : > { %480 = vperm.xlu1 %919, %v312_v16  }
  0xb3   : > { %v332_v18 = vpop.permute.xlu0 %331 }
  0xb5   : > { %v322_v19 = vpop.permute.xlu1 %321 }
  0xb7   : > { %v337_v23 = vpop.permute.xlu0 %336 }
  0xb9   : > { %v327_v26 = vpop.permute.xlu1 %326 }
  0xbb   : > { %v414_v44 = vpop.permute.xlu0 %413 }
  0xbd   : > { %v419_v47 = vpop.permute.xlu1 %418 }
  0xbf   : > { %v476_v5 = vpop.permute.xlu0 %475 }
  0xc1   : > { %v481_v9 = vpop.permute.xlu1 %480 }
 0x101   : > { %v825_v20 = vpop.f32.mrf.mxu0 }
 0x102   : > { %v399_v22 = vadd.f32 %v825_v20, %v332_v18 }
 0x103   : > { %v390_v21 = vpop.f32.mrf.mxu0 }
 0x104   : > { %v407_v28 = vmax.f32 %v399_v22, 0.0  ;;  %v391_v29 = vadd.f32 %v390_v21, %v322_v19 }
 0x105   : > { %v826_v24 = vpop.f32.mrf.mxu0 }
 0x106   : > { %v402_v25 = vadd.f32 %v826_v24, %v337_v23  ;;  %v405_v36 = vmax.f32 %v391_v29, 0.0 }
 0x107   : > { %v393_v27 = vpop.f32.mrf.mxu0 }
 0x108   : > { %v408_v30 = vmax.f32 %v402_v25, 0.0  ;;  %v394_v31 = vadd.f32 %v393_v27, %v327_v26 }
 0x10a   : > { %v406_v32 = vmax.f32 %v394_v31, 0.0  ;;  %v410_v33 = vpack.c.bf16 %v408_v30, %v407_v28 }
 0x10c   : > { %828 = vmatpush3.bf16.msra.mxu1 %v410_v33  ;;  %v409_v38 = vpack.c.bf16 %v406_v32, %v405_v36 }
 0x10d   : > { %829 = vmatprep.subr.bf16.mxu1 %v1023_v17 }
 0x110   : > { %830 = vmatpush3.bf16.msra.mxu1 %v409_v38 }
 0x111   : > { %841 = vmatprep.subr.bf16.mxu1 %v541_v37 }
 0x113   : > { %832 = vmatmul.mubr.msk.bf16.vlgmr.msra.gmra.mxu1 %vm349_vm0, %v922_v41 }
 0x114   : > { %842 = vmatpush3.bf16.msra.mxu1 %v541_v37  ;;  %845 = vmatprep.mubr.msk.bf16.mxu1 %vm349_vm0, %v920_v7 }
 0x115   : > { %843 = vmatprep.subr.bf16.mxu1 %v540_v42 }
 0x118   : > { %844 = vmatpush3.bf16.msra.mxu1 %v540_v42 }
 0x119   : > { %857 = vmatprep.subr.bf16.mxu1 %v1023_v17 }
 0x11b   : > { %846 = vmatmul.mubr.msk.bf16.vlgmr.msra.gmra.mxu1 %vm349_vm0, %v921_v11 }
 0x11c   : > { %859 = vmatprep.mubr.msk.bf16.mxu1 %vm1024_vm1, %v1023_v17 }
 0x1d3   : > { %v463_v43 = vpop.f32.mrf.mxu1 }
 0x1d4   : > { %v464_v46 = vadd.f32 %v463_v43, %v414_v44 }
 0x1d5   : > { %v833_v45 = vpop.f32.mrf.mxu1 }
 0x1d6   : > { %v470_v51 = vmax.f32 %v464_v46, 0.0 }
 0x1d7   : > { %v466_v48 = vpop.f32.mrf.mxu1 }
 0x1d8   : > { %v467_v49 = vadd.f32 %v466_v48, %v419_v47 }
 0x1d9   : > { %v834_v50 = vpop.f32.mrf.mxu1 }
 0x1da   : > { %v471_v52 = vmax.f32 %v467_v49, 0.0 }
 0x1db   : > { %v847_v53 = vpop.f32.mrf.mxu1 }
 0x1dc   : > { %v472_v54 = vpack.c.bf16 %v471_v52, %v470_v51  ;;  %v585_v57 = vadd.f32 %v847_v53, %v332_v18 }
 0x1dd   : > { %v576_v55 = vpop.f32.mrf.mxu1 }
 0x1de   : > { %836 = vmatpush3.bf16.msra.mxu0 %v472_v54  ;;  %v593_v61 = vmax.f32 %v585_v57, 0.0  ;;  %v577_v62 = vadd.f32 %v576_v55, %v322_v19 }
 0x1df   : > { %v848_v58 = vpop.f32.mrf.mxu1  ;;  %849 = vmatprep.subr.bf16.mxu0 %v1023_v17 }
 0x1e0   : > { %v588_v59 = vadd.f32 %v848_v58, %v337_v23  ;;  %v591_v3 = vmax.f32 %v577_v62, 0.0 }
 0x1e1   : > { %838 = vmatmul.mubr.msk.bf16.vlgmr.msra.gmra.mxu0 %vm488_vm2, %v923_v56  ;;  %v579_v60 = vpop.f32.mrf.mxu1 }
 0x1e2   : > { %v594_v63 = vmax.f32 %v588_v59, 0.0  ;;  %v580_v0 = vadd.f32 %v579_v60, %v327_v26  ;;  %853 = vmatprep.mubr.msk.bf16.mxu0 %vm1024_vm1, %v1023_v17 }
 0x1e4   : > { %v596_v1 = vpack.c.bf16 %v594_v63, %v593_v61  ;;  %v592_v2 = vmax.f32 %v580_v0, 0.0 }
 0x1e6   : > { %850 = vmatpush3.bf16.msra.mxu0 %v596_v1  ;;  %v595_v4 = vpack.c.bf16 %v592_v2, %v591_v3 }
 0x1e7   : > { %851 = vmatprep.subr.bf16.mxu0 %v1023_v17 }
 0x1ea   : > { %852 = vmatpush3.bf16.msra.mxu0 %v595_v4 }
 0x1ed   : > { %854 = vmatmul.mubr.msk.bf16.vlgmr.msra.gmra.mxu0 %vm349_vm0, %v922_v41 }
 0x2a1   : > { %v526_v6 = vpop.f32.mrf.mxu0 }
 0x2a2   : > { %v527_v7 = vadd.f32 %v526_v6, %v476_v5 }
 0x2a3   : > { %v839_v8 = vpop.f32.mrf.mxu0 }
 0x2a4   : > { %533 = vst [vmem:[%s295_s20] sm:$0xff] %v527_v7 }
 0x2a5   : > { %v529_v10 = vpop.f32.mrf.mxu0 }
 0x2a6   : > { %v530_v11 = vadd.f32 %v529_v10, %v481_v9 }
 0x2a7   : > { %v840_v12 = vpop.f32.mrf.mxu0 }
 0x2a8   : > { %534 = vst [vmem:[%s295_s20 + $0x8] sm:$0xff] %v530_v11 }
 0x2ad   : > { %v631_v13 = vpop.f32.mrf.mxu0 }
 0x2ae   : > { %v632_v15 = vadd.f32 %v631_v13, %v414_v44 }
 0x2af   : > { %v855_v14 = vpop.f32.mrf.mxu0 }
 0x2b0   : > { %v638_v19 = vmax.f32 %v632_v15, 0.0 }
 0x2b1   : > { %v634_v16 = vpop.f32.mrf.mxu0 }
 0x2b2   : > { %v635_v17 = vadd.f32 %v634_v16, %v419_v47 }
 0x2b3   : > { %v856_v18 = vpop.f32.mrf.mxu0 }
 0x2b4   : > { %v639_v20 = vmax.f32 %v635_v17, 0.0 }
 0x2b6   : > { %v640_v21 = vpack.c.bf16 %v639_v20, %v638_v19 }
 0x2b8   : > { %858 = vmatpush3.bf16.msra.mxu1 %v640_v21 }
 0x2bb   : > { %860 = vmatmul.mubr.msk.bf16.vlgmr.msra.gmra.mxu1 %vm488_vm2, %v923_v56 }
 0x37b   : > { %v675_v22 = vpop.f32.mrf.mxu1 }
 0x37c   : > { %v676_v23 = vadd.f32 %v675_v22, %v476_v5 }
 0x37d   : > { %v861_v24 = vpop.f32.mrf.mxu1 }
 0x37e   : > { %795 = vst [vmem:[%s295_s20 + $0x10] sm:$0xff] %v676_v23 }
 0x37f   : > { %v678_v25 = vpop.f32.mrf.mxu1 }
 0x380   : > { %v679_v26 = vadd.f32 %v678_v25, %v481_v9 }
 0x381   : > { %v862_v27 = vpop.f32.mrf.mxu1 }
 0x382   : > { %796 = vst [vmem:[%s295_s20 + $0x18] sm:$0xff] %v679_v26 }
 0x383   : > { %965 = shalt.err (!%p962_p10)
}
 0x384   : > { %s966_s19 = scalar_lea.hbm %s1251_s21, 512  ;;  %s970_s20 = scalar_lea.hbm %s1301_s7, 1024 }
 0x385   : > { %p967_p1 = scmp.ne.s32.totalorder %s1251_s21, %s966_s19  ;;  %p971_p0 = scmp.lt.s32.totalorder %s1251_s21, %s1301_s7 }
 0x386   : > { %p972_p2 = scmp.lt.s32.totalorder %s970_s20, %s966_s19 }
 0x387   : > { %p968_p3 = pnand %p967_p1, %p1311_p12 }
 0x388   : > { %p973_p6 = por %p972_p2, %p971_p0 }
 0x389   : > { %p969_p9 = pneg %p968_p3 }
 0x38b   : > { %p974_p11 = pnand %p973_p6, %p969_p9 }
 0x38d   : > { %977 = shalt.err (!%p974_p11)
}
 0x38e   : > { %s1026_s29 = smov 128   ;;  %s1027_s8 = smov 256  }
 0x38f   : > { %s1028_s28 = smov 8  }
 0x390   : > { %865 = dma.vmem_to_hbm [thread:$0]  (%p1311_p12), %s1246_s22, 512, %s1251_s21, %s686_s9, %s1026_s29, %s1027_s8, %s1028_s28  }
 0x391 PF: > { %s713_s16 = sand.u32 1, %s1004_s24   ;;  %p1312_p13 = scmp.ne.s32.totalorder %s1307_s14, 0 }
 0x392   : > { %p1313_p4 = scmp.ge.s32.totalorder %s1016_s27, 2  ;;  %s714_s11 = scalar_lea.sflag [#allocation4], %s713_s16 }
 0x394   : > { %p872_p5 = pnand %p1313_p4, %p1312_p13 }
 0x396   : > { %p873_p7 = pneg %p872_p5 }
 0x398   : > { %999 = dma.done.wait (%p873_p7), %s714_s11, 512  }
 0x399   : > { %1001 = vsyncadd (%p873_p7), %s714_s11, 4294966784  ;;  %p20_p8 = scmp.ge.s32.totalorder %s1094_s30, 4   ;;  %s1314_s24 = smov %s1008_s25 }
 0x39a   : > { %s1315_s25 = smov %s1012_s26  ;;  %s1316_s26 = smov %s1106_s10 }
 0x39b   : > { %s1317_s27 = smov %s1094_s30  ;;  %22 = sbr.rel (!%p20_p8) target bundleno = 5 (0x5), region = 95 }
 0x3a0   :  { %719 = vsyncpa [#allocation3], 1 }
 0x3a1   :  { %721 = vsyncpa [#allocation3 + $0x1], 1 }
 0x3a2   :  { %722 = vsyncpa [#allocation4], 1 }
 0x3a3   :  { %724 = vsyncpa [#allocation4 + $0x1], 1 }

</bundles_post_ra>
